<compile_context>
chip_gen: v7x
topology: tpu7x:2x2x1
jax: 0.10.0
libtpu: 0.0.40
codegen_flags: <defaults>
</compile_context>

<pallas_src>
import jax
import jax.numpy as jnp
from jax.experimental import pallas as pl
from jax.experimental.pallas import tpu as pltpu

LANE = 128
TILE_M_MAX = 4096       # max im2col rows per grid step
SPLIT_MIN_M = 1024      # force >=2 grid steps above this (v7x megacore)
_EPS = 1e-5
GRAY_COEF = jnp.array([0.2989, 0.587, 0.114], dtype=jnp.float32)

BLOCK_CFG = [(1, 32, 4), (4, 128, 64), (64, 128, 64), (64, 128, 64)]


def _round_up(x, m):
    return (x + m - 1) // m * m


def _cdiv(a, b):
    return -(-a // b)


# ---------------------------------------------------------------------------
# Pallas kernel: fused conv-block on an im2col row tile
# ---------------------------------------------------------------------------
def _block_kernel(p_ref, w1_ref, b1_ref, w2_ref, b2_ref, o_ref):
    # p : (tile_m, K)      bf16   im2col patch tile
    # w1: (K, Cmid)        bf16   3x3 conv weights, BN scale folded
    # b1: (1, Cmid)        f32    folded BN bias
    # w2: (Cmid, Cout)     bf16   1x1 conv weights, BN scale folded
    # b2: (1, Cout)        f32    folded BN bias
    # o : (tile_m, Cout)   bf16   block output (unpadded channels)
    h = jnp.dot(p_ref[...], w1_ref[...], preferred_element_type=jnp.float32)
    h = h + b1_ref[...]                          # folded BatchNorm bias (eval)
    h = h * jax.nn.sigmoid(h)                    # SiLU, f32
    y = jnp.dot(h.astype(w2_ref.dtype), w2_ref[...],
                preferred_element_type=jnp.float32)
    y = y + b2_ref[...]                          # folded BatchNorm bias (eval)
    y = y * jax.nn.sigmoid(y)                    # SiLU, f32
    o_ref[...] = y.astype(o_ref.dtype)           # bf16 store


def block_pallas(patches, blk):
    """Run one fused conv block. patches: (M, K) bf16. Returns (M, c_out) bf16."""
    w1, b1, w2, b2 = blk["w1"], blk["b1"], blk["w2"], blk["b2"]
    M, K = patches.shape
    k_pad, c_mid = w1.shape
    c_out = w2.shape[1]

    # Balanced row tiles: never more than one partial tile of padding, and
    # >=2 grid steps when M is large enough (keeps both v7x cores busy).
    n_tiles = _cdiv(M, TILE_M_MAX)
    if n_tiles == 1 and M >= SPLIT_MIN_M:
        n_tiles = 2
    tile_m = _round_up(_cdiv(M, n_tiles), 16)     # 16: bf16 sublane packing
    m_pad = _round_up(M, tile_m)

    if (m_pad != M) or (k_pad != K):
        patches = jnp.pad(patches, ((0, m_pad - M), (0, k_pad - K)))

    out = pl.pallas_call(
        _block_kernel,
        out_shape=jax.ShapeDtypeStruct((m_pad, c_out), jnp.bfloat16),
        grid_spec=pltpu.PrefetchScalarGridSpec(
            num_scalar_prefetch=0,
            grid=(m_pad // tile_m,),
            in_specs=[
                pl.BlockSpec((tile_m, k_pad), lambda i: (i, 0)),    # P tile
                pl.BlockSpec((k_pad, c_mid), lambda i: (0, 0)),     # w1 (resident)
                pl.BlockSpec((1, c_mid), lambda i: (0, 0)),         # b1
                pl.BlockSpec((c_mid, c_out), lambda i: (0, 0)),     # w2
                pl.BlockSpec((1, c_out), lambda i: (0, 0)),         # b2
            ],
            out_specs=pl.BlockSpec((tile_m, c_out), lambda i: (i, 0)),
        ),
        compiler_params=pltpu.CompilerParams(
            dimension_semantics=("parallel",),       # megacore-shardable grid
            vmem_limit_bytes=32 * 1024 * 1024,       # safe on v5e/v6e/v7x
        ),
    )(patches, w1, b1, w2, b2)

    if m_pad != M:
        out = out[:M]
    return out


# ---------------------------------------------------------------------------
# Plain-JAX glue
# ---------------------------------------------------------------------------
def im2col_3x3_s2_p1(x_nhwc):
    """im2col for kernel=3, stride=2, pad=1.  (N*Ho*Wo, 9*C) tap-major/ch-minor."""
    N, H, W, C = x_nhwc.shape
    ks, stride, pad = 3, 2, 1
    Ho = (H + 2 * pad - ks) // stride + 1
    Wo = (W + 2 * pad - ks) // stride + 1
    xp = jnp.pad(x_nhwc, ((0, 0), (pad, pad), (pad, pad), (0, 0)))
    cols = []
    for kh in range(ks):
        for kw in range(ks):
            patch = xp[:, kh:kh + stride * (Ho - 1) + 1:stride,
                          kw:kw + stride * (Wo - 1) + 1:stride, :]
            cols.append(patch)  # (N, Ho, Wo, C)
    P = jnp.concatenate(cols, axis=-1)  # tap-major, channel-minor
    return P.reshape(N * Ho * Wo, ks * ks * C), Ho, Wo


def nearest_upsample(x_nhwc, out_h, out_w):
    """PyTorch F.interpolate(mode='nearest'). Exact repeat for integer ratios."""
    N, H, W, C = x_nhwc.shape
    if out_h % H == 0 and out_w % W == 0:
        fh, fw = out_h // H, out_w // W
        y = jnp.broadcast_to(x_nhwc[:, :, None, :, None, :],
                             (N, H, fh, W, fw, C))
        return y.reshape(N, out_h, out_w, C)
    # general fallback: src = floor(dst * in/out)
    idx_h = (jnp.arange(out_h) * H) // out_h
    idx_w = (jnp.arange(out_w) * W) // out_w
    return x_nhwc[:, idx_h][:, :, idx_w]


# ---------------------------------------------------------------------------
# Parameter construction (deterministic, synthetic) + folding / padding
# ---------------------------------------------------------------------------
def _folded_bn(key, ch):
    kg, kb, km, kv = jax.random.split(key, 4)
    gamma = 1.0 + 0.1 * jax.random.normal(kg, (ch,), jnp.float32)
    beta = 0.1 * jax.random.normal(kb, (ch,), jnp.float32)
    mean = 0.1 * jax.random.normal(km, (ch,), jnp.float32)
    var = 1.0 + 0.1 * jnp.abs(jax.random.normal(kv, (ch,), jnp.float32))
    scale = gamma / jnp.sqrt(var + _EPS)
    bias = beta - mean * scale
    return scale.reshape(1, ch), bias.reshape(1, ch)


def init_params(key):
    """Raw, unfolded per-block params in im2col (tap-major, ch-minor) layout."""
    params = []
    for (c_in, c_mid, c_out) in BLOCK_CFG:
        key, k1, k2, k3, k4 = jax.random.split(key, 5)
        fan1 = 9 * c_in
        w1 = jax.random.normal(k1, (fan1, c_mid), jnp.float32) * (2.0 / fan1) ** 0.5
        w2 = jax.random.normal(k2, (c_mid, c_out), jnp.float32) * (2.0 / c_mid) ** 0.5
        s1, b1 = _folded_bn(k3, c_mid)
        s2, b2 = _folded_bn(k4, c_out)
        params.append((w1, s1, b1, w2, s2, b2))
    return params


def prepare_params(raw_params):
    """Fold grayscale into block 1, fold BN scales into weights (f32), pad K, cast bf16."""
    prepared = []
    for idx, (w1, s1, b1, w2, s2, b2) in enumerate(raw_params):
        c_mid, c_out = w1.shape[1], w2.shape[1]
        if idx == 0:
            # fold gray = coef . rgb into conv1: w1_fold[t*3+c, :] = coef[c]*w1[t, :]
            w1 = (w1.reshape(9, 1, c_mid) * GRAY_COEF[None, :, None]).reshape(27, c_mid)
        # fold eval-mode BN scale into weights (f32 fold, then bf16 cast)
        w1 = w1 * s1                       # (K, c_mid) * (1, c_mid)
        w2 = w2 * s2                       # (c_mid, c_out) * (1, c_out)
        k_eff = w1.shape[0]
        k_pad = _round_up(k_eff, 16)       # bf16 sublane multiple for the patch tile
        prepared.append(dict(
            w1=jnp.pad(w1, ((0, k_pad - k_eff), (0, 0))).astype(jnp.bfloat16),
            b1=b1,                          # (1, c_mid) f32
            w2=w2.astype(jnp.bfloat16),
            b2=b2,                          # (1, c_out) f32
            c_out=c_out,
        ))
    return prepared


# ---------------------------------------------------------------------------
# Forward pass
# ---------------------------------------------------------------------------
def upsample_concat_backbone(x_nchw, prepared_params):
    N, C, H, W = x_nchw.shape
    x = jnp.transpose(x_nchw, (0, 2, 3, 1)).astype(jnp.float32)  # NHWC

    feats = [x]  # original input (all C channels), f32

    # grayscale projection is folded into block 1's weights -> feed RGB directly
    cur = x[..., 0:3].astype(jnp.bfloat16)

    for blk in prepared_params:
        P, Ho, Wo = im2col_3x3_s2_p1(cur)          # bf16 patch matrix
        y = block_pallas(P, blk)                   # (M, c_out) bf16, unpadded
        y = y.reshape(N, Ho, Wo, blk["c_out"])
        feats.append(nearest_upsample(y.astype(jnp.float32), H, W))
        cur = y                                    # bf16 already, no extra cast pass

    out = jnp.concatenate(feats, axis=-1)          # NHWC, f32
    return jnp.transpose(out, (0, 3, 1, 2))        # back to NCHW


# ---------------------------------------------------------------------------
if __name__ == "__main__":
    key = jax.random.PRNGKey(0)
    k_x, k_p = jax.random.split(key)

    # small, forward-consistent shapes: batch=2, 3 input channels, 16x16 spatial
    x = jax.random.normal(k_x, (2, 3, 16, 16), dtype=jnp.float32)
    params = prepare_params(init_params(k_p))

    fwd = jax.jit(lambda inp: upsample_concat_backbone(inp, params))
    out = jax.block_until_ready(fwd(x))

    expected_c = 3 + sum(cfg[2] for cfg in BLOCK_CFG)   # 3 + 4 + 64 + 64 + 64 = 199
    assert out.shape == (2, expected_c, 16, 16), out.shape
    assert bool(jnp.all(jnp.isfinite(out)))
    print("KERNEL_OK")
</pallas_src>

<mosaic_0001>
module attributes {stable_mosaic.version = 11 : i64} {
  func.func @_block_kernel(%arg0: i32, %arg1: memref<128x32xbf16, #tpu.memory_space<vmem>>, %arg2: memref<32x32xbf16, #tpu.memory_space<vmem>>, %arg3: memref<1x32xf32, #tpu.memory_space<vmem>>, %arg4: memref<32x4xbf16, #tpu.memory_space<vmem>>, %arg5: memref<1x4xf32, #tpu.memory_space<vmem>>, %arg6: memref<128x4xbf16, #tpu.memory_space<vmem>>) attributes {dimension_semantics = [#tpu.dimension_semantics<parallel>], iteration_bounds = array<i64: 1>, scalar_prefetch = 0 : i64, scratch_operands = 0 : i64, tpu.core_type = #tpu.core_type<tc>, window_params = [{transform_indices = @transform_0, window_bounds = array<i64: 128, 32>}, {pipeline_mode = #tpu.pipeline_mode<synchronous>, transform_indices = @transform_1, window_bounds = array<i64: 32, 32>}, {pipeline_mode = #tpu.pipeline_mode<synchronous>, transform_indices = @transform_2, window_bounds = array<i64: 1, 32>}, {pipeline_mode = #tpu.pipeline_mode<synchronous>, transform_indices = @transform_3, window_bounds = array<i64: 32, 4>}, {pipeline_mode = #tpu.pipeline_mode<synchronous>, transform_indices = @transform_4, window_bounds = array<i64: 1, 4>}, {transform_indices = @transform_5, window_bounds = array<i64: 128, 4>}]} {
    %c0 = arith.constant 0 : index
    %c0_0 = arith.constant 0 : index
    %0 = vector.load %arg1[%c0, %c0_0] : memref<128x32xbf16, #tpu.memory_space<vmem>>, vector<128x32xbf16>
    %c0_1 = arith.constant 0 : index
    %c0_2 = arith.constant 0 : index
    %1 = vector.load %arg2[%c0_1, %c0_2] : memref<32x32xbf16, #tpu.memory_space<vmem>>, vector<32x32xbf16>
    %cst = arith.constant dense<0.000000e+00> : vector<128x32xf32>
    %2 = tpu.matmul %0, %1, %cst {dimension_numbers = #tpu.dot_dimension_numbers<[1], [0], [0], [1], [0, 0, 1, 1], [], []>} : vector<128x32xbf16>, vector<32x32xbf16>, vector<128x32xf32> -> vector<128x32xf32>
    %c0_3 = arith.constant 0 : index
    %c0_4 = arith.constant 0 : index
    %3 = vector.load %arg3[%c0_3, %c0_4] : memref<1x32xf32, #tpu.memory_space<vmem>>, vector<1x32xf32>
    %4 = vector.broadcast %3 : vector<1x32xf32> to vector<128x32xf32>
    %5 = arith.addf %2, %4 : vector<128x32xf32>
    %6 = arith.negf %5 : vector<128x32xf32>
    %7 = math.exp %6 : vector<128x32xf32>
    %cst_5 = arith.constant 1.000000e+00 : f32
    %8 = vector.broadcast %cst_5 : f32 to vector<128x32xf32>
    %9 = arith.addf %8, %7 : vector<128x32xf32>
    %10 = arith.divf %8, %9 : vector<128x32xf32>
    %11 = arith.mulf %5, %10 : vector<128x32xf32>
    %12 = arith.truncf %11 : vector<128x32xf32> to vector<128x32xbf16>
    %c0_6 = arith.constant 0 : index
    %c0_7 = arith.constant 0 : index
    %13 = vector.load %arg4[%c0_6, %c0_7] : memref<32x4xbf16, #tpu.memory_space<vmem>>, vector<32x4xbf16>
    %cst_8 = arith.constant dense<0.000000e+00> : vector<128x4xf32>
    %14 = tpu.matmul %12, %13, %cst_8 {dimension_numbers = #tpu.dot_dimension_numbers<[1], [0], [0], [1], [0, 0, 1, 1], [], []>} : vector<128x32xbf16>, vector<32x4xbf16>, vector<128x4xf32> -> vector<128x4xf32>
    %c0_9 = arith.constant 0 : index
    %c0_10 = arith.constant 0 : index
    %15 = vector.load %arg5[%c0_9, %c0_10] : memref<1x4xf32, #tpu.memory_space<vmem>>, vector<1x4xf32>
    %16 = vector.broadcast %15 : vector<1x4xf32> to vector<128x4xf32>
    %17 = arith.addf %14, %16 : vector<128x4xf32>
    %18 = arith.negf %17 : vector<128x4xf32>
    %19 = math.exp %18 : vector<128x4xf32>
    %cst_11 = arith.constant 1.000000e+00 : f32
    %20 = vector.broadcast %cst_11 : f32 to vector<128x4xf32>
    %21 = arith.addf %20, %19 : vector<128x4xf32>
    %22 = arith.divf %20, %21 : vector<128x4xf32>
    %23 = arith.mulf %17, %22 : vector<128x4xf32>
    %24 = arith.truncf %23 : vector<128x4xf32> to vector<128x4xbf16>
    %c0_12 = arith.constant 0 : index
    %c0_13 = arith.constant 0 : index
    %25 = vector.load %arg6[%c0_12, %c0_13] : memref<128x4xbf16, #tpu.memory_space<vmem>>, vector<128x4xbf16>
    tpu.vector_store %arg6[%c0_12, %c0_13], %24 {strides = array<i32>} : memref<128x4xbf16, #tpu.memory_space<vmem>>, vector<128x4xbf16>,
    return
  }
  func.func @transform_0(%arg0: i32) -> (i32, i32) {
    %c0_i32 = arith.constant 0 : i32
    %c0_i32_0 = arith.constant 0 : i32
    return %arg0, %c0_i32 : i32, i32
  }
  func.func @transform_1(%arg0: i32) -> (i32, i32) {
    %c0_i32 = arith.constant 0 : i32
    %c0_i32_0 = arith.constant 0 : i32
    %c0_i32_1 = arith.constant 0 : i32
    return %c0_i32, %c0_i32_0 : i32, i32
  }
  func.func @transform_2(%arg0: i32) -> (i32, i32) {
    %c0_i32 = arith.constant 0 : i32
    %c0_i32_0 = arith.constant 0 : i32
    %c0_i32_1 = arith.constant 0 : i32
    return %c0_i32, %c0_i32_0 : i32, i32
  }
  func.func @transform_3(%arg0: i32) -> (i32, i32) {
    %c0_i32 = arith.constant 0 : i32
    %c0_i32_0 = arith.constant 0 : i32
    %c0_i32_1 = arith.constant 0 : i32
    return %c0_i32, %c0_i32_0 : i32, i32
  }
  func.func @transform_4(%arg0: i32) -> (i32, i32) {
    %c0_i32 = arith.constant 0 : i32
    %c0_i32_0 = arith.constant 0 : i32
    %c0_i32_1 = arith.constant 0 : i32
    return %c0_i32, %c0_i32_0 : i32, i32
  }
  func.func @transform_5(%arg0: i32) -> (i32, i32) {
    %c0_i32 = arith.constant 0 : i32
    %c0_i32_0 = arith.constant 0 : i32
    return %arg0, %c0_i32 : i32, i32
  }
}

module attributes {stable_mosaic.version = 11 : i64} {
  func.func @_block_kernel(%arg0: i32, %arg1: memref<32x48xbf16, #tpu.memory_space<vmem>>, %arg2: memref<48x128xbf16, #tpu.memory_space<vmem>>, %arg3: memref<1x128xf32, #tpu.memory_space<vmem>>, %arg4: memref<128x64xbf16, #tpu.memory_space<vmem>>, %arg5: memref<1x64xf32, #tpu.memory_space<vmem>>, %arg6: memref<32x64xbf16, #tpu.memory_space<vmem>>) attributes {dimension_semantics = [#tpu.dimension_semantics<parallel>], iteration_bounds = array<i64: 1>, scalar_prefetch = 0 : i64, scratch_operands = 0 : i64, tpu.core_type = #tpu.core_type<tc>, window_params = [{transform_indices = @transform_0, window_bounds = array<i64: 32, 48>}, {pipeline_mode = #tpu.pipeline_mode<synchronous>, transform_indices = @transform_1, window_bounds = array<i64: 48, 128>}, {pipeline_mode = #tpu.pipeline_mode<synchronous>, transform_indices = @transform_2, window_bounds = array<i64: 1, 128>}, {pipeline_mode = #tpu.pipeline_mode<synchronous>, transform_indices = @transform_3, window_bounds = array<i64: 128, 64>}, {pipeline_mode = #tpu.pipeline_mode<synchronous>, transform_indices = @transform_4, window_bounds = array<i64: 1, 64>}, {transform_indices = @transform_5, window_bounds = array<i64: 32, 64>}]} {
    %c0 = arith.constant 0 : index
    %c0_0 = arith.constant 0 : index
    %0 = vector.load %arg1[%c0, %c0_0] : memref<32x48xbf16, #tpu.memory_space<vmem>>, vector<32x48xbf16>
    %c0_1 = arith.constant 0 : index
    %c0_2 = arith.constant 0 : index
    %1 = vector.load %arg2[%c0_1, %c0_2] : memref<48x128xbf16, #tpu.memory_space<vmem>>, vector<48x128xbf16>
    %cst = arith.constant dense<0.000000e+00> : vector<32x128xf32>
    %2 = tpu.matmul %0, %1, %cst {dimension_numbers = #tpu.dot_dimension_numbers<[1], [0], [0], [1], [0, 0, 1, 1], [], []>} : vector<32x48xbf16>, vector<48x128xbf16>, vector<32x128xf32> -> vector<32x128xf32>
    %c0_3 = arith.constant 0 : index
    %c0_4 = arith.constant 0 : index
    %3 = vector.load %arg3[%c0_3, %c0_4] : memref<1x128xf32, #tpu.memory_space<vmem>>, vector<1x128xf32>
    %4 = vector.broadcast %3 : vector<1x128xf32> to vector<32x128xf32>
    %5 = arith.addf %2, %4 : vector<32x128xf32>
    %6 = arith.negf %5 : vector<32x128xf32>
    %7 = math.exp %6 : vector<32x128xf32>
    %cst_5 = arith.constant 1.000000e+00 : f32
    %8 = vector.broadcast %cst_5 : f32 to vector<32x128xf32>
    %9 = arith.addf %8, %7 : vector<32x128xf32>
    %10 = arith.divf %8, %9 : vector<32x128xf32>
    %11 = arith.mulf %5, %10 : vector<32x128xf32>
    %12 = arith.truncf %11 : vector<32x128xf32> to vector<32x128xbf16>
    %c0_6 = arith.constant 0 : index
    %c0_7 = arith.constant 0 : index
    %13 = vector.load %arg4[%c0_6, %c0_7] : memref<128x64xbf16, #tpu.memory_space<vmem>>, vector<128x64xbf16>
    %cst_8 = arith.constant dense<0.000000e+00> : vector<32x64xf32>
    %14 = tpu.matmul %12, %13, %cst_8 {dimension_numbers = #tpu.dot_dimension_numbers<[1], [0], [0], [1], [0, 0, 1, 1], [], []>} : vector<32x128xbf16>, vector<128x64xbf16>, vector<32x64xf32> -> vector<32x64xf32>
    %c0_9 = arith.constant 0 : index
    %c0_10 = arith.constant 0 : index
    %15 = vector.load %arg5[%c0_9, %c0_10] : memref<1x64xf32, #tpu.memory_space<vmem>>, vector<1x64xf32>
    %16 = vector.broadcast %15 : vector<1x64xf32> to vector<32x64xf32>
    %17 = arith.addf %14, %16 : vector<32x64xf32>
    %18 = arith.negf %17 : vector<32x64xf32>
    %19 = math.exp %18 : vector<32x64xf32>
    %cst_11 = arith.constant 1.000000e+00 : f32
    %20 = vector.broadcast %cst_11 : f32 to vector<32x64xf32>
    %21 = arith.addf %20, %19 : vector<32x64xf32>
    %22 = arith.divf %20, %21 : vector<32x64xf32>
    %23 = arith.mulf %17, %22 : vector<32x64xf32>
    %24 = arith.truncf %23 : vector<32x64xf32> to vector<32x64xbf16>
    %c0_12 = arith.constant 0 : index
    %c0_13 = arith.constant 0 : index
    %25 = vector.load %arg6[%c0_12, %c0_13] : memref<32x64xbf16, #tpu.memory_space<vmem>>, vector<32x64xbf16>
    tpu.vector_store %arg6[%c0_12, %c0_13], %24 {strides = array<i32>} : memref<32x64xbf16, #tpu.memory_space<vmem>>, vector<32x64xbf16>,
    return
  }
  func.func @transform_0(%arg0: i32) -> (i32, i32) {
    %c0_i32 = arith.constant 0 : i32
    %c0_i32_0 = arith.constant 0 : i32
    return %arg0, %c0_i32 : i32, i32
  }
  func.func @transform_1(%arg0: i32) -> (i32, i32) {
    %c0_i32 = arith.constant 0 : i32
    %c0_i32_0 = arith.constant 0 : i32
    %c0_i32_1 = arith.constant 0 : i32
    return %c0_i32, %c0_i32_0 : i32, i32
  }
  func.func @transform_2(%arg0: i32) -> (i32, i32) {
    %c0_i32 = arith.constant 0 : i32
    %c0_i32_0 = arith.constant 0 : i32
    %c0_i32_1 = arith.constant 0 : i32
    return %c0_i32, %c0_i32_0 : i32, i32
  }
  func.func @transform_3(%arg0: i32) -> (i32, i32) {
    %c0_i32 = arith.constant 0 : i32
    %c0_i32_0 = arith.constant 0 : i32
    %c0_i32_1 = arith.constant 0 : i32
    return %c0_i32, %c0_i32_0 : i32, i32
  }
  func.func @transform_4(%arg0: i32) -> (i32, i32) {
    %c0_i32 = arith.constant 0 : i32
    %c0_i32_0 = arith.constant 0 : i32
    %c0_i32_1 = arith.constant 0 : i32
    return %c0_i32, %c0_i32_0 : i32, i32
  }
  func.func @transform_5(%arg0: i32) -> (i32, i32) {
    %c0_i32 = arith.constant 0 : i32
    %c0_i32_0 = arith.constant 0 : i32
    return %arg0, %c0_i32 : i32, i32
  }
}

module attributes {stable_mosaic.version = 11 : i64} {
  func.func @_block_kernel(%arg0: i32, %arg1: memref<16x576xbf16, #tpu.memory_space<vmem>>, %arg2: memref<576x128xbf16, #tpu.memory_space<vmem>>, %arg3: memref<1x128xf32, #tpu.memory_space<vmem>>, %arg4: memref<128x64xbf16, #tpu.memory_space<vmem>>, %arg5: memref<1x64xf32, #tpu.memory_space<vmem>>, %arg6: memref<16x64xbf16, #tpu.memory_space<vmem>>) attributes {dimension_semantics = [#tpu.dimension_semantics<parallel>], iteration_bounds = array<i64: 1>, scalar_prefetch = 0 : i64, scratch_operands = 0 : i64, tpu.core_type = #tpu.core_type<tc>, window_params = [{transform_indices = @transform_0, window_bounds = array<i64: 16, 576>}, {pipeline_mode = #tpu.pipeline_mode<synchronous>, transform_indices = @transform_1, window_bounds = array<i64: 576, 128>}, {pipeline_mode = #tpu.pipeline_mode<synchronous>, transform_indices = @transform_2, window_bounds = array<i64: 1, 128>}, {pipeline_mode = #tpu.pipeline_mode<synchronous>, transform_indices = @transform_3, window_bounds = array<i64: 128, 64>}, {pipeline_mode = #tpu.pipeline_mode<synchronous>, transform_indices = @transform_4, window_bounds = array<i64: 1, 64>}, {transform_indices = @transform_5, window_bounds = array<i64: 16, 64>}]} {
    %c0 = arith.constant 0 : index
    %c0_0 = arith.constant 0 : index
    %0 = vector.load %arg1[%c0, %c0_0] : memref<16x576xbf16, #tpu.memory_space<vmem>>, vector<16x576xbf16>
    %c0_1 = arith.constant 0 : index
    %c0_2 = arith.constant 0 : index
    %1 = vector.load %arg2[%c0_1, %c0_2] : memref<576x128xbf16, #tpu.memory_space<vmem>>, vector<576x128xbf16>
    %cst = arith.constant dense<0.000000e+00> : vector<16x128xf32>
    %2 = tpu.matmul %0, %1, %cst {dimension_numbers = #tpu.dot_dimension_numbers<[1], [0], [0], [1], [0, 0, 1, 1], [], []>} : vector<16x576xbf16>, vector<576x128xbf16>, vector<16x128xf32> -> vector<16x128xf32>
    %c0_3 = arith.constant 0 : index
    %c0_4 = arith.constant 0 : index
    %3 = vector.load %arg3[%c0_3, %c0_4] : memref<1x128xf32, #tpu.memory_space<vmem>>, vector<1x128xf32>
    %4 = vector.broadcast %3 : vector<1x128xf32> to vector<16x128xf32>
    %5 = arith.addf %2, %4 : vector<16x128xf32>
    %6 = arith.negf %5 : vector<16x128xf32>
    %7 = math.exp %6 : vector<16x128xf32>
    %cst_5 = arith.constant 1.000000e+00 : f32
    %8 = vector.broadcast %cst_5 : f32 to vector<16x128xf32>
    %9 = arith.addf %8, %7 : vector<16x128xf32>
    %10 = arith.divf %8, %9 : vector<16x128xf32>
    %11 = arith.mulf %5, %10 : vector<16x128xf32>
    %12 = arith.truncf %11 : vector<16x128xf32> to vector<16x128xbf16>
    %c0_6 = arith.constant 0 : index
    %c0_7 = arith.constant 0 : index
    %13 = vector.load %arg4[%c0_6, %c0_7] : memref<128x64xbf16, #tpu.memory_space<vmem>>, vector<128x64xbf16>
    %cst_8 = arith.constant dense<0.000000e+00> : vector<16x64xf32>
    %14 = tpu.matmul %12, %13, %cst_8 {dimension_numbers = #tpu.dot_dimension_numbers<[1], [0], [0], [1], [0, 0, 1, 1], [], []>} : vector<16x128xbf16>, vector<128x64xbf16>, vector<16x64xf32> -> vector<16x64xf32>
    %c0_9 = arith.constant 0 : index
    %c0_10 = arith.constant 0 : index
    %15 = vector.load %arg5[%c0_9, %c0_10] : memref<1x64xf32, #tpu.memory_space<vmem>>, vector<1x64xf32>
    %16 = vector.broadcast %15 : vector<1x64xf32> to vector<16x64xf32>
    %17 = arith.addf %14, %16 : vector<16x64xf32>
    %18 = arith.negf %17 : vector<16x64xf32>
    %19 = math.exp %18 : vector<16x64xf32>
    %cst_11 = arith.constant 1.000000e+00 : f32
    %20 = vector.broadcast %cst_11 : f32 to vector<16x64xf32>
    %21 = arith.addf %20, %19 : vector<16x64xf32>
    %22 = arith.divf %20, %21 : vector<16x64xf32>
    %23 = arith.mulf %17, %22 : vector<16x64xf32>
    %24 = arith.truncf %23 : vector<16x64xf32> to vector<16x64xbf16>
    %c0_12 = arith.constant 0 : index
    %c0_13 = arith.constant 0 : index
    %25 = vector.load %arg6[%c0_12, %c0_13] : memref<16x64xbf16, #tpu.memory_space<vmem>>, vector<16x64xbf16>
    tpu.vector_store %arg6[%c0_12, %c0_13], %24 {strides = array<i32>} : memref<16x64xbf16, #tpu.memory_space<vmem>>, vector<16x64xbf16>,
    return
  }
  func.func @transform_0(%arg0: i32) -> (i32, i32) {
    %c0_i32 = arith.constant 0 : i32
    %c0_i32_0 = arith.constant 0 : i32
    return %arg0, %c0_i32 : i32, i32
  }
  func.func @transform_1(%arg0: i32) -> (i32, i32) {
    %c0_i32 = arith.constant 0 : i32
    %c0_i32_0 = arith.constant 0 : i32
    %c0_i32_1 = arith.constant 0 : i32
    return %c0_i32, %c0_i32_0 : i32, i32
  }
  func.func @transform_2(%arg0: i32) -> (i32, i32) {
    %c0_i32 = arith.constant 0 : i32
    %c0_i32_0 = arith.constant 0 : i32
    %c0_i32_1 = arith.constant 0 : i32
    return %c0_i32, %c0_i32_0 : i32, i32
  }
  func.func @transform_3(%arg0: i32) -> (i32, i32) {
    %c0_i32 = arith.constant 0 : i32
    %c0_i32_0 = arith.constant 0 : i32
    %c0_i32_1 = arith.constant 0 : i32
    return %c0_i32, %c0_i32_0 : i32, i32
  }
  func.func @transform_4(%arg0: i32) -> (i32, i32) {
    %c0_i32 = arith.constant 0 : i32
    %c0_i32_0 = arith.constant 0 : i32
    %c0_i32_1 = arith.constant 0 : i32
    return %c0_i32, %c0_i32_0 : i32, i32
  }
  func.func @transform_5(%arg0: i32) -> (i32, i32) {
    %c0_i32 = arith.constant 0 : i32
    %c0_i32_0 = arith.constant 0 : i32
    return %arg0, %c0_i32 : i32, i32
  }
}

</mosaic_0001>

<bundles_post_ra>
// kernel: _lambda_.4
= control target key start
LH: loop header
LB: loop body
LE: loop exit
PB: predicated region body
PF: predicated region fallthrough
CT: control target
= control target key end

     0   :  { %vm100_vm0 = vcmask 261120   ;;  %vm662_vm1 = vcmask 27648   ;;  %s1293_s1 = inlined_call_operand.vmem [shape: bf16[32,32], index: 1, kind: input, shape index: {}]   ;;  %s1294_s0 = inlined_call_operand.vmem [shape: bf16[128,32], index: 0, kind: input, shape index: {}]   ;;  %s1295_s3 = inlined_call_operand.vmem [shape: bf16[32,4], index: 3, kind: input, shape index: {}]   ;;  %s1296_s2 = inlined_call_operand.vmem [shape: f32[1,32], index: 2, kind: input, shape index: {}]   ;;  %s1297_s4 = inlined_call_operand.vmem [shape: f32[1,4], index: 4, kind: input, shape index: {}]   ;;  %s1298_s5 = inlined_call_operand.vmem [shape: bf16[128,4], index: 5, kind: output, shape index: {}]  }
   0x1   :  { %v837_v0 = vld [vmem:[%s1293_s1] sm:$0xff]   ;;  %v838_v1 = vld [vmem:[%s1293_s1 + $0x8] sm:$0xff]   ;;  %v841_v4 = vld [vmem:[%s1294_s0 + $0x10] sm:$0xff]  }
   0x2   :  { %797 = vmatprep.subr.bf16.mxu0 %v837_v0  ;;  %v839_v2 = vld [vmem:[%s1294_s0] sm:$0xff]   ;;  %v840_v3 = vld [vmem:[%s1294_s0 + $0x8] sm:$0xff]   ;;  %v842_v5 = vld [vmem:[%s1294_s0 + $0x18] sm:$0xff]  }
   0x3   :  { %798 = vmatpush3.bf16.msra.mxu0 %v837_v0  ;;  %801 = vmatprep.mubr.msk.bf16.mxu0 %vm100_vm0, %v839_v2  ;;  %v843_v6 = vld [vmem:[%s1294_s0 + $0x20] sm:$0xff]   ;;  %v844_v7 = vld [vmem:[%s1294_s0 + $0x28] sm:$0xff]   ;;  %v845_v8 = vld [vmem:[%s1294_s0 + $0x30] sm:$0xff]  }
   0x4   :  { %799 = vmatprep.subr.bf16.mxu0 %v838_v1  ;;  %v846_v9 = vld [vmem:[%s1294_s0 + $0x38] sm:$0xff]   ;;  %v847_v10 = vld [vmem:[%s1295_s3] sm:$0xff]   ;;  %v848_v11 = vld [vmem:[%s1295_s3 + $0x8] sm:$0xff]  }
   0x5   :  { %817 = vmatprep.subr.bf16.mxu1 %v847_v10  ;;  %v1054_v12 = vld [vmem:[%s1296_s2] ss:$0 sm:$0xff] }
   0x6   :  { %818 = vmatpush3.bf16.msra.mxu1 %v847_v10 }
   0x7   :  { %800 = vmatpush3.bf16.msra.mxu0 %v838_v1  ;;  %819 = vmatprep.subr.bf16.mxu1 %v848_v11 }
   0xa   :  { %802 = vmatmul.mubr.msk.bf16.vlgmr.msra.gmra.mrb[0].mxu0 %vm100_vm0, %v840_v3  ;;  %820 = vmatpush3.bf16.msra.mxu1 %v848_v11 }
   0xb   :  { %805 = vmatprep.mubr.msk.bf16.mxu0 %vm100_vm0, %v841_v4 }
  0x12   :  { %806 = vmatmul.mubr.msk.bf16.gmra.mrb[4].mxu0 %vm100_vm0, %v842_v5 }
  0x13   :  { %809 = vmatprep.mubr.msk.bf16.mxu0 %vm100_vm0, %v843_v6 }
  0x1a   :  { %810 = vmatmul.mubr.msk.bf16.gmra.mrb[8].mxu0 %vm100_vm0, %v844_v7 }
  0x1b   :  { %813 = vmatprep.mubr.msk.bf16.mxu0 %vm100_vm0, %v845_v8 }
  0x22   :  { %814 = vmatmul.mubr.msk.bf16.gmra.mrb[12].mxu0 %vm100_vm0, %v846_v9 }
  0xdd   :  { %v803_v13 = vpop.f32.mrb[0].mxu0 }
  0xde   :  { %v1057_v14 = vadd.f32 %v803_v13, %v1054_v12  ;;  %v159_v15 = vpop.f32.mrb[1].mxu0 }
  0xdf   :  { %v1060_v16 = vadd.f32 %v1054_v12, %v159_v15  ;;  %v804_v17 = vpop.f32.mrb[2].mxu0 }
  0xe0   :  { %v704_v18 = vmul.f32 -1.442695, %v1057_v14  ;;  %v1064_v19 = vadd.f32 %v804_v17, %v1054_v12  ;;  %v162_v20 = vpop.f32.mrb[3].mxu0 }
  0xe1   :  { %v702_v21 = vmul.f32 -1.442695, %v1060_v16  ;;  %v1068_v22 = vadd.f32 %v1054_v12, %v162_v20 }
  0xe2   :  { %849 = vpow2.f32 %v704_v18  ;;  %v705_v23 = vmul.f32 -1.442695, %v1064_v19 }
  0xe3   :  { %851 = vpow2.f32 %v702_v21  ;;  %v703_v24 = vmul.f32 -1.442695, %v1068_v22 }
  0xe4   :  { %853 = vpow2.f32 %v705_v23 }
  0xe5   :  { %855 = vpow2.f32 %v703_v24  ;;  %v807_v25 = vpop.f32.mrb[4].mxu0 }
  0xe6   :  { %v1073_v26 = vadd.f32 %v807_v25, %v1054_v12  ;;  %v175_v27 = vpop.f32.mrb[5].mxu0 }
  0xe7   :  { %v1076_v28 = vadd.f32 %v1054_v12, %v175_v27  ;;  %v808_v29 = vpop.f32.mrb[6].mxu0 }
  0xe8   :  { %v708_v30 = vmul.f32 -1.442695, %v1073_v26  ;;  %v1080_v31 = vadd.f32 %v808_v29, %v1054_v12  ;;  %v178_v32 = vpop.f32.mrb[7].mxu0 }
  0xe9   :  { %v706_v33 = vmul.f32 -1.442695, %v1076_v28  ;;  %v1084_v34 = vadd.f32 %v1054_v12, %v178_v32 }
  0xea   :  { %857 = vpow2.f32 %v708_v30  ;;  %v709_v35 = vmul.f32 -1.442695, %v1080_v31 }
  0xeb   :  { %859 = vpow2.f32 %v706_v33  ;;  %v707_v36 = vmul.f32 -1.442695, %v1084_v34 }
  0xec   :  { %v850_v37 = vpop.eup %849  ;;  %861 = vpow2.f32 %v709_v35 }
  0xed   :  { %v852_v38 = vpop.eup %851  ;;  %v272_v39 = vadd.f32 1.0, %v850_v37  ;;  %863 = vpow2.f32 %v707_v36  ;;  %v811_v40 = vpop.f32.mrb[8].mxu0 }
  0xee   :  { %v854_v41 = vpop.eup %853  ;;  %v270_v42 = vadd.f32 1.0, %v852_v38  ;;  %v1089_v43 = vadd.f32 %v811_v40, %v1054_v12  ;;  %v191_v44 = vpop.f32.mrb[9].mxu0 }
  0xef   :  { %v856_v45 = vpop.eup %855  ;;  %865 = vrcp.f32 %v272_v39  ;;  %v273_v46 = vadd.f32 1.0, %v854_v41  ;;  %v1092_v47 = vadd.f32 %v1054_v12, %v191_v44  ;;  %v812_v48 = vpop.f32.mrb[10].mxu0 }
  0xf0   :  { %867 = vrcp.f32 %v270_v42  ;;  %v271_v49 = vadd.f32 1.0, %v856_v45  ;;  %v712_v50 = vmul.f32 -1.442695, %v1089_v43  ;;  %v1096_v51 = vadd.f32 %v812_v48, %v1054_v12  ;;  %v194_v52 = vpop.f32.mrb[11].mxu0 }
  0xf1   :  { %869 = vrcp.f32 %v273_v46  ;;  %v710_v53 = vmul.f32 -1.442695, %v1092_v47  ;;  %v1100_v54 = vadd.f32 %v1054_v12, %v194_v52 }
  0xf2   :  { %871 = vrcp.f32 %v271_v49  ;;  %v713_v55 = vmul.f32 -1.442695, %v1096_v51 }
  0xf3   :  { %873 = vpow2.f32 %v712_v50  ;;  %v711_v56 = vmul.f32 -1.442695, %v1100_v54 }
  0xf4   :  { %v858_v57 = vpop.eup %857  ;;  %875 = vpow2.f32 %v710_v53 }
  0xf5   :  { %v860_v58 = vpop.eup %859  ;;  %v276_v59 = vadd.f32 1.0, %v858_v57  ;;  %877 = vpow2.f32 %v713_v55  ;;  %v815_v60 = vpop.f32.mrb[12].mxu0 }
  0xf6   :  { %v862_v61 = vpop.eup %861  ;;  %v274_v62 = vadd.f32 1.0, %v860_v58  ;;  %879 = vpow2.f32 %v711_v56  ;;  %v1105_v63 = vadd.f32 %v815_v60, %v1054_v12  ;;  %v207_v0 = vpop.f32.mrb[13].mxu0 }
  0xf7   :  { %v864_v1 = vpop.eup %863  ;;  %881 = vrcp.f32 %v276_v59  ;;  %v277_v2 = vadd.f32 1.0, %v862_v61  ;;  %v1108_v3 = vadd.f32 %v1054_v12, %v207_v0  ;;  %v816_v4 = vpop.f32.mrb[14].mxu0 }
  0xf8   :  { %883 = vrcp.f32 %v274_v62  ;;  %v275_v5 = vadd.f32 1.0, %v864_v1  ;;  %v716_v6 = vmul.f32 -1.442695, %v1105_v63  ;;  %v1112_v7 = vadd.f32 %v816_v4, %v1054_v12  ;;  %v210_v8 = vpop.f32.mrb[15].mxu0 }
  0xf9   :  { %v866_v9 = vpop.eup %865  ;;  %885 = vrcp.f32 %v277_v2  ;;  %v714_v10 = vmul.f32 -1.442695, %v1108_v3  ;;  %v1116_v11 = vadd.f32 %v1054_v12, %v210_v8  ;;  %v1147_v8 = vld [vmem:[%s1297_s4] ss:$0 sm:$0xff] }
  0xfa   :  { %v868_v13 = vpop.eup %867  ;;  %887 = vrcp.f32 %v275_v5  ;;  %v717_v15 = vmul.f32 -1.442695, %v1112_v7  ;;  %v320_v21 = vmul.f32 %v866_v9, %v1057_v14 }
  0xfb   :  { %v870_v17 = vpop.eup %869  ;;  %889 = vpow2.f32 %v716_v6  ;;  %v715_v18 = vmul.f32 -1.442695, %v1116_v11  ;;  %v318_v25 = vmul.f32 %v868_v13, %v1060_v16 }
  0xfc   :  { %v872_v20 = vpop.eup %871  ;;  %v321_v23 = vmul.f32 %v870_v17, %v1064_v19  ;;  %891 = vpow2.f32 %v714_v10 }
  0xfd   :  { %v874_v24 = vpop.eup %873  ;;  %v319_v12 = vmul.f32 %v872_v20, %v1068_v22  ;;  %893 = vpow2.f32 %v717_v15 }
  0xfe   :  { %v876_v27 = vpop.eup %875  ;;  %v335_v29 = vpack.c.bf16 %v321_v23, %v320_v21  ;;  %v280_v30 = vadd.f32 1.0, %v874_v24  ;;  %895 = vpow2.f32 %v715_v18 }
  0xff   :  { %v878_v32 = vpop.eup %877  ;;  %v278_v33 = vadd.f32 1.0, %v876_v27  ;;  %v334_v35 = vpack.c.bf16 %v319_v12, %v318_v25 }
 0x100   :  { %v880_v36 = vpop.eup %879  ;;  %897 = vrcp.f32 %v280_v30  ;;  %v281_v37 = vadd.f32 1.0, %v878_v32 }
 0x101   :  { %v882_v14 = vpop.eup %881  ;;  %899 = vrcp.f32 %v278_v33  ;;  %v279_v19 = vadd.f32 1.0, %v880_v36  ;;  %821 = vmatprep.mubr.msk.bf16.mxu1 %vm100_vm0, %v334_v35 }
 0x102   :  { %v884_v38 = vpop.eup %883  ;;  %901 = vrcp.f32 %v281_v37  ;;  %822 = vmatmul.mubr.msk.bf16.vlgmr.msra.gmra.mrb[0].mxu1 %vm100_vm0, %v335_v29  ;;  %v324_v39 = vmul.f32 %v882_v14, %v1073_v26 }
 0x103   :  { %v886_v16 = vpop.eup %885  ;;  %903 = vrcp.f32 %v279_v19  ;;  %v322_v42 = vmul.f32 %v884_v38, %v1076_v28 }
 0x104   :  { %v888_v22 = vpop.eup %887  ;;  %v325_v40 = vmul.f32 %v886_v16, %v1080_v31 }
 0x105   :  { %v890_v41 = vpop.eup %889  ;;  %v323_v44 = vmul.f32 %v888_v22, %v1084_v34 }
 0x106   :  { %v892_v45 = vpop.eup %891  ;;  %v337_v46 = vpack.c.bf16 %v325_v40, %v324_v39  ;;  %v284_v48 = vadd.f32 1.0, %v890_v41 }
 0x107   :  { %v894_v49 = vpop.eup %893  ;;  %v336_v50 = vpack.c.bf16 %v323_v44, %v322_v42  ;;  %v282_v52 = vadd.f32 1.0, %v892_v45 }
 0x108   :  { %v896_v53 = vpop.eup %895  ;;  %905 = vrcp.f32 %v284_v48  ;;  %v285_v55 = vadd.f32 1.0, %v894_v49 }
 0x109   :  { %907 = vrcp.f32 %v282_v52  ;;  %v283_v56 = vadd.f32 1.0, %v896_v53  ;;  %825 = vmatprep.mubr.msk.bf16.mxu1 %vm100_vm0, %v336_v50 }
 0x10a   :  { %v898_v26 = vpop.eup %897  ;;  %909 = vrcp.f32 %v285_v55  ;;  %826 = vmatmul.mubr.msk.bf16.gmra.mrb[4].mxu1 %vm100_vm0, %v337_v46 }
 0x10b   :  { %v900_v28 = vpop.eup %899  ;;  %911 = vrcp.f32 %v283_v56  ;;  %v328_v57 = vmul.f32 %v898_v26, %v1089_v43 }
 0x10c   :  { %v902_v31 = vpop.eup %901  ;;  %v326_v59 = vmul.f32 %v900_v28, %v1092_v47 }
 0x10d   :  { %v904_v34 = vpop.eup %903  ;;  %v329_v58 = vmul.f32 %v902_v31, %v1096_v51 }
 0x10e   :  { %v327_v60 = vmul.f32 %v904_v34, %v1100_v54 }
 0x10f   :  { %v339_v61 = vpack.c.bf16 %v329_v58, %v328_v57 }
 0x110   :  { %v338_v62 = vpack.c.bf16 %v327_v60, %v326_v59 }
 0x112   :  { %v906_v0 = vpop.eup %905  ;;  %829 = vmatprep.mubr.msk.bf16.mxu1 %vm100_vm0, %v338_v62 }
 0x113   :  { %v908_v1 = vpop.eup %907  ;;  %830 = vmatmul.mubr.msk.bf16.gmra.mrb[8].mxu1 %vm100_vm0, %v339_v61  ;;  %v332_v5 = vmul.f32 %v906_v0, %v1105_v63 }
 0x114   :  { %v910_v2 = vpop.eup %909  ;;  %v330_v51 = vmul.f32 %v908_v1, %v1108_v3 }
 0x115   :  { %v912_v4 = vpop.eup %911  ;;  %v333_v43 = vmul.f32 %v910_v2, %v1112_v7 }
 0x116   :  { %v331_v47 = vmul.f32 %v912_v4, %v1116_v11 }
 0x117   :  { %v341_v6 = vpack.c.bf16 %v333_v43, %v332_v5 }
 0x118   :  { %v340_v54 = vpack.c.bf16 %v331_v47, %v330_v51 }
 0x11a   :  { %833 = vmatprep.mubr.msk.bf16.mxu1 %vm100_vm0, %v340_v54 }
 0x11b   :  { %834 = vmatmul.mubr.msk.bf16.gmra.mrb[12].mxu1 %vm100_vm0, %v341_v6 }
 0x1d5   :  { %v823_v9 = vpop.f32.mrb[0].mxu1 }
 0x1d6   :  { %v1150_v63 = vadd.f32 %v823_v9, %v1147_v8  ;;  %v423_v7 = vpop.f32.mrb[1].mxu1 }
 0x1d7   :  { %v1153_v3 = vadd.f32 %v1147_v8, %v423_v7  ;;  %v824_v10 = vpop.f32.mrb[2].mxu1 }
 0x1d8   :  { %v731_v11 = vmul.f32 -1.442695, %v1150_v63  ;;  %v1157_v13 = vadd.f32 %v824_v10, %v1147_v8  ;;  %v426_v15 = vpop.f32.mrb[3].mxu1 }
 0x1d9   :  { %v729_v17 = vmul.f32 -1.442695, %v1153_v3  ;;  %v1161_v18 = vadd.f32 %v1147_v8, %v426_v15 }
 0x1da   :  { %913 = vpow2.f32 %v731_v11  ;;  %v732_v20 = vmul.f32 -1.442695, %v1157_v13 }
 0x1db   :  { %915 = vpow2.f32 %v729_v17  ;;  %v730_v21 = vmul.f32 -1.442695, %v1161_v18 }
 0x1dc   :  { %917 = vpow2.f32 %v732_v20 }
 0x1dd   :  { %919 = vpow2.f32 %v730_v21  ;;  %v827_v23 = vpop.f32.mrb[4].mxu1 }
 0x1de   :  { %v1166_v24 = vadd.f32 %v827_v23, %v1147_v8  ;;  %v439_v25 = vpop.f32.mrb[5].mxu1 }
 0x1df   :  { %v1169_v12 = vadd.f32 %v1147_v8, %v439_v25  ;;  %v828_v27 = vpop.f32.mrb[6].mxu1 }
 0x1e0   :  { %v735_v29 = vmul.f32 -1.442695, %v1166_v24  ;;  %v1173_v30 = vadd.f32 %v828_v27, %v1147_v8  ;;  %v442_v32 = vpop.f32.mrb[7].mxu1 }
 0x1e1   :  { %v733_v33 = vmul.f32 -1.442695, %v1169_v12  ;;  %v1177_v35 = vadd.f32 %v1147_v8, %v442_v32 }
 0x1e2   :  { %921 = vpow2.f32 %v735_v29  ;;  %v736_v36 = vmul.f32 -1.442695, %v1173_v30 }
 0x1e3   :  { %923 = vpow2.f32 %v733_v33  ;;  %v734_v37 = vmul.f32 -1.442695, %v1177_v35 }
 0x1e4   :  { %v914_v14 = vpop.eup %913  ;;  %925 = vpow2.f32 %v736_v36 }
 0x1e5   :  { %v916_v19 = vpop.eup %915  ;;  %v536_v38 = vadd.f32 1.0, %v914_v14  ;;  %927 = vpow2.f32 %v734_v37 }
 0x1e6   :  { %v918_v16 = vpop.eup %917  ;;  %v534_v22 = vadd.f32 1.0, %v916_v19  ;;  %v831_v39 = vpop.f32.mrb[8].mxu1 }
 0x1e7   :  { %v920_v40 = vpop.eup %919  ;;  %929 = vrcp.f32 %v536_v38  ;;  %v537_v41 = vadd.f32 1.0, %v918_v16  ;;  %v1182_v42 = vadd.f32 %v831_v39, %v1147_v8  ;;  %v455_v44 = vpop.f32.mrb[9].mxu1 }
 0x1e8   :  { %931 = vrcp.f32 %v534_v22  ;;  %v535_v45 = vadd.f32 1.0, %v920_v40  ;;  %v1185_v46 = vadd.f32 %v1147_v8, %v455_v44  ;;  %v832_v48 = vpop.f32.mrb[10].mxu1 }
 0x1e9   :  { %933 = vrcp.f32 %v537_v41  ;;  %v739_v49 = vmul.f32 -1.442695, %v1182_v42  ;;  %v1189_v50 = vadd.f32 %v832_v48, %v1147_v8  ;;  %v458_v52 = vpop.f32.mrb[11].mxu1 }
 0x1ea   :  { %935 = vrcp.f32 %v535_v45  ;;  %v737_v53 = vmul.f32 -1.442695, %v1185_v46  ;;  %v1193_v55 = vadd.f32 %v1147_v8, %v458_v52 }
 0x1eb   :  { %937 = vpow2.f32 %v739_v49  ;;  %v740_v56 = vmul.f32 -1.442695, %v1189_v50 }
 0x1ec   :  { %v922_v26 = vpop.eup %921  ;;  %939 = vpow2.f32 %v737_v53  ;;  %v738_v28 = vmul.f32 -1.442695, %v1193_v55 }
 0x1ed   :  { %v924_v31 = vpop.eup %923  ;;  %v540_v34 = vadd.f32 1.0, %v922_v26  ;;  %941 = vpow2.f32 %v740_v56 }
 0x1ee   :  { %v926_v57 = vpop.eup %925  ;;  %v538_v58 = vadd.f32 1.0, %v924_v31  ;;  %943 = vpow2.f32 %v738_v28  ;;  %v835_v59 = vpop.f32.mrb[12].mxu1 }
 0x1ef   :  { %v928_v60 = vpop.eup %927  ;;  %945 = vrcp.f32 %v540_v34  ;;  %v541_v61 = vadd.f32 1.0, %v926_v57  ;;  %v1198_v62 = vadd.f32 %v835_v59, %v1147_v8  ;;  %v471_v0 = vpop.f32.mrb[13].mxu1 }
 0x1f0   :  { %947 = vrcp.f32 %v538_v58  ;;  %v539_v1 = vadd.f32 1.0, %v928_v60  ;;  %v1201_v2 = vadd.f32 %v1147_v8, %v471_v0  ;;  %v836_v4 = vpop.f32.mrb[14].mxu1 }
 0x1f1   :  { %v930_v5 = vpop.eup %929  ;;  %949 = vrcp.f32 %v541_v61  ;;  %v743_v43 = vmul.f32 -1.442695, %v1198_v62  ;;  %v1205_v51 = vadd.f32 %v836_v4, %v1147_v8  ;;  %v474_v47 = vpop.f32.mrb[15].mxu1 }
 0x1f2   :  { %v932_v6 = vpop.eup %931  ;;  %v584_v54 = vmul.f32 %v930_v5, %v1150_v63  ;;  %951 = vrcp.f32 %v539_v1  ;;  %v741_v9 = vmul.f32 -1.442695, %v1201_v2  ;;  %v1210_v7 = vadd.f32 %v1147_v8, %v474_v47 }
 0x1f3   :  { %v934_v10 = vpop.eup %933  ;;  %v582_v11 = vmul.f32 %v932_v6, %v1153_v3  ;;  %953 = vpow2.f32 %v743_v43  ;;  %v744_v15 = vmul.f32 -1.442695, %v1205_v51 }
 0x1f4   :  { %v936_v17 = vpop.eup %935  ;;  %v763_v20 = vpack.c.bf16 %v584_v54, %v584_v54  ;;  %v585_v21 = vmul.f32 %v934_v10, %v1157_v13  ;;  %955 = vpow2.f32 %v741_v9  ;;  %v742_v63 = vmul.f32 -1.442695, %v1210_v7 }
 0x1f5   :  { %v938_v23 = vpop.eup %937  ;;  %v761_v25 = vpack.c.bf16 %v582_v11, %v582_v11  ;;  %v583_v27 = vmul.f32 %v936_v17, %v1161_v18  ;;  %957 = vpow2.f32 %v744_v15 }
 0x1f6   :  { %v940_v8 = vpop.eup %939  ;;  %665 = vst.msk [vmem:[%s1298_s5 + $0x8] sm:$0xf] %vm662_vm1, %v763_v20  ;;  %v764_v3 = vpack.c.bf16 %v585_v21, %v585_v21  ;;  %v544_v29 = vadd.f32 1.0, %v938_v23  ;;  %959 = vpow2.f32 %v742_v63 }
 0x1f7   :  { %v942_v32 = vpop.eup %941  ;;  %663 = vst.msk [vmem:[%s1298_s5] sm:$0xf] %vm662_vm1, %v761_v25  ;;  %v762_v13 = vpack.c.bf16 %v583_v27, %v583_v27  ;;  %v542_v33 = vadd.f32 1.0, %v940_v8 }
 0x1f8   :  { %v944_v36 = vpop.eup %943  ;;  %666 = vst.msk [vmem:[%s1298_s5 + $0xc] sm:$0xf] %vm662_vm1, %v764_v3  ;;  %961 = vrcp.f32 %v544_v29  ;;  %v545_v18 = vadd.f32 1.0, %v942_v32 }
 0x1f9   :  { %v946_v37 = vpop.eup %945  ;;  %664 = vst.msk [vmem:[%s1298_s5 + $0x4] sm:$0xf] %vm662_vm1, %v762_v13  ;;  %963 = vrcp.f32 %v542_v33  ;;  %v543_v14 = vadd.f32 1.0, %v944_v36 }
 0x1fa   :  { %v948_v19 = vpop.eup %947  ;;  %v588_v38 = vmul.f32 %v946_v37, %v1166_v24  ;;  %965 = vrcp.f32 %v545_v18 }
 0x1fb   :  { %v950_v16 = vpop.eup %949  ;;  %v586_v22 = vmul.f32 %v948_v19, %v1169_v12  ;;  %967 = vrcp.f32 %v543_v14 }
 0x1fc   :  { %v952_v39 = vpop.eup %951  ;;  %v767_v40 = vpack.c.bf16 %v588_v38, %v588_v38  ;;  %v589_v41 = vmul.f32 %v950_v16, %v1173_v30 }
 0x1fd   :  { %v954_v44 = vpop.eup %953  ;;  %v765_v45 = vpack.c.bf16 %v586_v22, %v586_v22  ;;  %v587_v48 = vmul.f32 %v952_v39, %v1177_v35 }
 0x1fe   :  { %v956_v49 = vpop.eup %955  ;;  %669 = vst.msk [vmem:[%s1298_s5 + $0x18] sm:$0xf] %vm662_vm1, %v767_v40  ;;  %v768_v24 = vpack.c.bf16 %v589_v41, %v589_v41  ;;  %v548_v52 = vadd.f32 1.0, %v954_v44 }
 0x1ff   :  { %v958_v53 = vpop.eup %957  ;;  %667 = vst.msk [vmem:[%s1298_s5 + $0x10] sm:$0xf] %vm662_vm1, %v765_v45  ;;  %v766_v12 = vpack.c.bf16 %v587_v48, %v587_v48  ;;  %v546_v30 = vadd.f32 1.0, %v956_v49 }
 0x200   :  { %v960_v56 = vpop.eup %959  ;;  %670 = vst.msk [vmem:[%s1298_s5 + $0x1c] sm:$0xf] %vm662_vm1, %v768_v24  ;;  %969 = vrcp.f32 %v548_v52  ;;  %v549_v35 = vadd.f32 1.0, %v958_v53 }
 0x201   :  { %668 = vst.msk [vmem:[%s1298_s5 + $0x14] sm:$0xf] %vm662_vm1, %v766_v12  ;;  %971 = vrcp.f32 %v546_v30  ;;  %v547_v26 = vadd.f32 1.0, %v960_v56 }
 0x202   :  { %v962_v28 = vpop.eup %961  ;;  %973 = vrcp.f32 %v549_v35 }
 0x203   :  { %v964_v31 = vpop.eup %963  ;;  %v592_v34 = vmul.f32 %v962_v28, %v1182_v42  ;;  %975 = vrcp.f32 %v547_v26 }
 0x204   :  { %v966_v57 = vpop.eup %965  ;;  %v590_v58 = vmul.f32 %v964_v31, %v1185_v46 }
 0x205   :  { %v968_v59 = vpop.eup %967  ;;  %v771_v60 = vpack.c.bf16 %v592_v34, %v592_v34  ;;  %v593_v61 = vmul.f32 %v966_v57, %v1189_v50 }
 0x206   :  { %v769_v0 = vpack.c.bf16 %v590_v58, %v590_v58  ;;  %v591_v1 = vmul.f32 %v968_v59, %v1193_v55 }
 0x207   :  { %673 = vst.msk [vmem:[%s1298_s5 + $0x28] sm:$0xf] %vm662_vm1, %v771_v60  ;;  %v772_v4 = vpack.c.bf16 %v593_v61, %v593_v61 }
 0x208   :  { %671 = vst.msk [vmem:[%s1298_s5 + $0x20] sm:$0xf] %vm662_vm1, %v769_v0  ;;  %v770_v42 = vpack.c.bf16 %v591_v1, %v591_v1 }
 0x209   :  { %674 = vst.msk [vmem:[%s1298_s5 + $0x2c] sm:$0xf] %vm662_vm1, %v772_v4 }
 0x20a   :  { %v970_v46 = vpop.eup %969  ;;  %672 = vst.msk [vmem:[%s1298_s5 + $0x24] sm:$0xf] %vm662_vm1, %v770_v42 }
 0x20b   :  { %v972_v50 = vpop.eup %971  ;;  %v596_v55 = vmul.f32 %v970_v46, %v1198_v62 }
 0x20c   :  { %v974_v5 = vpop.eup %973  ;;  %v594_v43 = vmul.f32 %v972_v50, %v1201_v2 }
 0x20d   :  { %v976_v47 = vpop.eup %975  ;;  %v775_v6 = vpack.c.bf16 %v596_v55, %v596_v55  ;;  %v597_v54 = vmul.f32 %v974_v5, %v1205_v51 }
 0x20e   :  { %v773_v9 = vpack.c.bf16 %v594_v43, %v594_v43  ;;  %v595_v10 = vmul.f32 %v976_v47, %v1210_v7 }
 0x20f   :  { %677 = vst.msk [vmem:[%s1298_s5 + $0x38] sm:$0xf] %vm662_vm1, %v775_v6  ;;  %v776_v11 = vpack.c.bf16 %v597_v54, %v597_v54 }
 0x210   :  { %675 = vst.msk [vmem:[%s1298_s5 + $0x30] sm:$0xf] %vm662_vm1, %v773_v9  ;;  %v774_v62 = vpack.c.bf16 %v595_v10, %v595_v10 }
 0x211   :  { %678 = vst.msk [vmem:[%s1298_s5 + $0x3c] sm:$0xf] %vm662_vm1, %v776_v11 }
 0x212   :  { %676 = vst.msk [vmem:[%s1298_s5 + $0x34] sm:$0xf] %vm662_vm1, %v774_v62 }

// kernel: _lambda_.5
= control target key start
LH: loop header
LB: loop body
LE: loop exit
PB: predicated region body
PF: predicated region fallthrough
CT: control target
= control target key end

     0   :  { %vm66_vm0 = vcmask 392192   ;;  %vm316_vm1 = vcmask 519168   ;;  %s535_s1 = inlined_call_operand.vmem [shape: bf16[48,128], index: 1, kind: input, shape index: {}]   ;;  %s536_s0 = inlined_call_operand.vmem [shape: bf16[32,48], index: 0, kind: input, shape index: {}]   ;;  %s537_s3 = inlined_call_operand.vmem [shape: bf16[128,64], index: 3, kind: input, shape index: {}]   ;;  %s538_s2 = inlined_call_operand.vmem [shape: f32[1,128], index: 2, kind: input, shape index: {}]   ;;  %s539_s4 = inlined_call_operand.vmem [shape: f32[1,64], index: 4, kind: input, shape index: {}]   ;;  %s540_s5 = inlined_call_operand.vmem [shape: bf16[32,64], index: 5, kind: output, shape index: {}]  }
   0x1   :  { %v403_v0 = vld [vmem:[%s535_s1] sm:$0xff]   ;;  %v404_v1 = vld [vmem:[%s535_s1 + $0x8] sm:$0xff]   ;;  %v405_v3 = vld [vmem:[%s535_s1 + $0x10] sm:$0xff]  }
   0x2   :  { %373 = vmatprep.subr.bf16.mxu0 %v403_v0  ;;  %v406_v2 = vld [vmem:[%s536_s0] sm:$0xff]   ;;  %v407_v4 = vld [vmem:[%s536_s0 + $0x8] sm:$0xff]   ;;  %v410_v7 = vld [vmem:[%s537_s3 + $0x10] sm:$0xff]  }
   0x3   :  { %374 = vmatpush3.bf16.msra.mxu0 %v403_v0  ;;  %379 = vmatprep.mubr.msk.bf16.mxu0 %vm66_vm0, %v406_v2  ;;  %v408_v5 = vld [vmem:[%s537_s3] sm:$0xff]   ;;  %v409_v6 = vld [vmem:[%s537_s3 + $0x8] sm:$0xff]   ;;  %v411_v8 = vld [vmem:[%s537_s3 + $0x18] sm:$0xff]  }
   0x4   :  { %375 = vmatprep.subr.bf16.mxu0 %v404_v1  ;;  %383 = vmatprep.subr.bf16.mxu1 %v408_v5  ;;  %v412_v9 = vld [vmem:[%s537_s3 + $0x20] sm:$0xff]   ;;  %v413_v10 = vld [vmem:[%s537_s3 + $0x28] sm:$0xff]   ;;  %v414_v11 = vld [vmem:[%s537_s3 + $0x30] sm:$0xff]  }
   0x5   :  { %384 = vmatpush3.bf16.msra.mxu1 %v408_v5  ;;  %v415_v12 = vld [vmem:[%s537_s3 + $0x38] sm:$0xff]   ;;  %v325_v13 = vld [vmem:[%s538_s2] ss:$0 sm:$0xff] }
   0x6   :  { %385 = vmatprep.subr.bf16.mxu1 %v409_v6  ;;  %v337_v44 = vld [vmem:[%s539_s4] ss:$0 sm:$0xff] }
   0x7   :  { %376 = vmatpush3.bf16.msra.mxu0 %v404_v1 }
   0x8   :  { %377 = vmatprep.subr.bf16.mxu0 %v405_v3 }
   0x9   :  { %386 = vmatpush3.bf16.msra.mxu1 %v409_v6 }
   0xa   :  { %387 = vmatprep.subr.bf16.mxu1 %v410_v7 }
   0xb   :  { %378 = vmatpush3.bf16.msra.mxu0 %v405_v3 }
   0xd   :  { %388 = vmatpush3.bf16.msra.mxu1 %v410_v7 }
   0xe   :  { %380 = vmatmul.mubr.msk.bf16.vlgmr.msra.gmra.mrb[0].mxu0 %vm66_vm0, %v407_v4  ;;  %389 = vmatprep.subr.bf16.mxu1 %v411_v8 }
  0x11   :  { %390 = vmatpush3.bf16.msra.mxu1 %v411_v8 }
  0x12   :  { %391 = vmatprep.subr.bf16.mxu1 %v412_v9 }
  0x15   :  { %392 = vmatpush3.bf16.msra.mxu1 %v412_v9 }
  0x16   :  { %393 = vmatprep.subr.bf16.mxu1 %v413_v10 }
  0x19   :  { %394 = vmatpush3.bf16.msra.mxu1 %v413_v10 }
  0x1a   :  { %395 = vmatprep.subr.bf16.mxu1 %v414_v11 }
  0x1d   :  { %396 = vmatpush3.bf16.msra.mxu1 %v414_v11 }
  0x1e   :  { %397 = vmatprep.subr.bf16.mxu1 %v415_v12 }
  0x21   :  { %398 = vmatpush3.bf16.msra.mxu1 %v415_v12 }
  0xe1   :  { %v381_v14 = vpop.f32.mrb[0].mxu0 }
  0xe2   :  { %v116_v15 = vadd.f32 %v381_v14, %v325_v13  ;;  %v107_v16 = vpop.f32.mrb[1].mxu0 }
  0xe3   :  { %v108_v17 = vadd.f32 %v325_v13, %v107_v16  ;;  %v382_v18 = vpop.f32.mrb[2].mxu0 }
  0xe4   :  { %v335_v19 = vmul.f32 -1.442695, %v116_v15  ;;  %v119_v20 = vadd.f32 %v382_v18, %v325_v13  ;;  %v110_v21 = vpop.f32.mrb[3].mxu0 }
  0xe5   :  { %v333_v22 = vmul.f32 -1.442695, %v108_v17  ;;  %v111_v23 = vadd.f32 %v325_v13, %v110_v21 }
  0xe6   :  { %416 = vpow2.f32 %v335_v19  ;;  %v336_v24 = vmul.f32 -1.442695, %v119_v20 }
  0xe7   :  { %418 = vpow2.f32 %v333_v22  ;;  %v334_v25 = vmul.f32 -1.442695, %v111_v23 }
  0xe8   :  { %420 = vpow2.f32 %v336_v24 }
  0xe9   :  { %422 = vpow2.f32 %v334_v25 }
  0xf0   :  { %v417_v26 = vpop.eup %416 }
  0xf1   :  { %v419_v27 = vpop.eup %418  ;;  %v136_v28 = vadd.f32 1.0, %v417_v26 }
  0xf2   :  { %v421_v29 = vpop.eup %420  ;;  %v134_v30 = vadd.f32 1.0, %v419_v27 }
  0xf3   :  { %v423_v31 = vpop.eup %422  ;;  %424 = vrcp.f32 %v136_v28  ;;  %v137_v32 = vadd.f32 1.0, %v421_v29 }
  0xf4   :  { %426 = vrcp.f32 %v134_v30  ;;  %v135_v33 = vadd.f32 1.0, %v423_v31 }
  0xf5   :  { %428 = vrcp.f32 %v137_v32 }
  0xf6   :  { %430 = vrcp.f32 %v135_v33 }
  0xfd   :  { %v425_v34 = vpop.eup %424 }
  0xfe   :  { %v427_v35 = vpop.eup %426  ;;  %v148_v38 = vmul.f32 %v425_v34, %v116_v15 }
  0xff   :  { %v429_v36 = vpop.eup %428  ;;  %v146_v40 = vmul.f32 %v427_v35, %v108_v17 }
 0x100   :  { %v431_v37 = vpop.eup %430  ;;  %v149_v39 = vmul.f32 %v429_v36, %v119_v20 }
 0x101   :  { %v147_v41 = vmul.f32 %v431_v37, %v111_v23 }
 0x102   :  { %v151_v42 = vpack.c.bf16 %v149_v39, %v148_v38 }
 0x103   :  { %v150_v43 = vpack.c.bf16 %v147_v41, %v146_v40 }
 0x105   :  { %399 = vmatprep.mubr.bf16.mxu1 %v150_v43 }
 0x106   :  { %400 = vmatmul.mubr.bf16.vlgmr.msra.gmra.mrb[0].mxu1 %v151_v42 }
 0x1d9   :  { %v401_v45 = vpop.f32.mrb[0].mxu1 }
 0x1da   :  { %v266_v46 = vadd.f32 %v401_v45, %v337_v44  ;;  %v257_v47 = vpop.f32.mrb[1].mxu1 }
 0x1db   :  { %v258_v48 = vadd.f32 %v337_v44, %v257_v47  ;;  %v402_v49 = vpop.f32.mrb[2].mxu1 }
 0x1dc   :  { %v348_v50 = vmul.f32 -1.442695, %v266_v46  ;;  %v269_v51 = vadd.f32 %v402_v49, %v337_v44  ;;  %v260_v52 = vpop.f32.mrb[3].mxu1 }
 0x1dd   :  { %v346_v53 = vmul.f32 -1.442695, %v258_v48  ;;  %v261_v54 = vadd.f32 %v337_v44, %v260_v52 }
 0x1de   :  { %432 = vpow2.f32 %v348_v50  ;;  %v349_v55 = vmul.f32 -1.442695, %v269_v51 }
 0x1df   :  { %434 = vpow2.f32 %v346_v53  ;;  %v347_v56 = vmul.f32 -1.442695, %v261_v54 }
 0x1e0   :  { %436 = vpow2.f32 %v349_v55 }
 0x1e1   :  { %438 = vpow2.f32 %v347_v56 }
 0x1e8   :  { %v433_v57 = vpop.eup %432 }
 0x1e9   :  { %v435_v58 = vpop.eup %434  ;;  %v286_v59 = vadd.f32 1.0, %v433_v57 }
 0x1ea   :  { %v437_v60 = vpop.eup %436  ;;  %v284_v61 = vadd.f32 1.0, %v435_v58 }
 0x1eb   :  { %v439_v62 = vpop.eup %438  ;;  %440 = vrcp.f32 %v286_v59  ;;  %v287_v63 = vadd.f32 1.0, %v437_v60 }
 0x1ec   :  { %442 = vrcp.f32 %v284_v61  ;;  %v285_v0 = vadd.f32 1.0, %v439_v62 }
 0x1ed   :  { %444 = vrcp.f32 %v287_v63 }
 0x1ee   :  { %446 = vrcp.f32 %v285_v0 }
 0x1f5   :  { %v441_v1 = vpop.eup %440 }
 0x1f6   :  { %v443_v2 = vpop.eup %442  ;;  %v298_v3 = vmul.f32 %v441_v1, %v266_v46 }
 0x1f7   :  { %v445_v4 = vpop.eup %444  ;;  %v296_v5 = vmul.f32 %v443_v2, %v258_v48 }
 0x1f8   :  { %v447_v6 = vpop.eup %446  ;;  %v356_v7 = vpack.c.bf16 %v298_v3, %v298_v3  ;;  %v299_v8 = vmul.f32 %v445_v4, %v269_v51 }
 0x1f9   :  { %v354_v9 = vpack.c.bf16 %v296_v5, %v296_v5  ;;  %v297_v10 = vmul.f32 %v447_v6, %v261_v54 }
 0x1fa   :  { %319 = vst.msk [vmem:[%s540_s5 + $0x8] sm:$0xf] %vm316_vm1, %v356_v7  ;;  %v357_v11 = vpack.c.bf16 %v299_v8, %v299_v8 }
 0x1fb   :  { %317 = vst.msk [vmem:[%s540_s5] sm:$0xf] %vm316_vm1, %v354_v9  ;;  %v355_v12 = vpack.c.bf16 %v297_v10, %v297_v10 }
 0x1fc   :  { %320 = vst.msk [vmem:[%s540_s5 + $0xc] sm:$0xf] %vm316_vm1, %v357_v11 }
 0x1fd   :  { %318 = vst.msk [vmem:[%s540_s5 + $0x4] sm:$0xf] %vm316_vm1, %v355_v12 }

// kernel: _lambda_.6
= control target key start
LH: loop header
LB: loop body
LE: loop exit
PB: predicated region body
PF: predicated region fallthrough
CT: control target
= control target key end

     0   :  { %v849_v33 = vmov 0.0   ;;  %vm850_vm0 = vmmov 0   ;;  %vm347_vm1 = vcmask 523264   ;;  %vm623_vm2 = vcmask 519168   ;;  %s1040_s1 = inlined_call_operand.vmem [shape: bf16[576,128], index: 1, kind: input, shape index: {}]   ;;  %s1041_s0 = inlined_call_operand.vmem [shape: bf16[16,576], index: 0, kind: input, shape index: {}]   ;;  %s1042_s3 = inlined_call_operand.vmem [shape: bf16[128,64], index: 3, kind: input, shape index: {}]   ;;  %s1043_s2 = inlined_call_operand.vmem [shape: f32[1,128], index: 2, kind: input, shape index: {}]   ;;  %s1044_s4 = inlined_call_operand.vmem [shape: f32[1,64], index: 4, kind: input, shape index: {}]   ;;  %s1045_s5 = inlined_call_operand.vmem [shape: bf16[16,64], index: 5, kind: output, shape index: {}]  }
   0x1   :  { %v782_v0 = vld [vmem:[%s1040_s1 + $0x40] sm:$0xff]   ;;  %v786_v4 = vld [vmem:[%s1040_s1 + $0x48] sm:$0xff]   ;;  %v790_v8 = vld [vmem:[%s1040_s1 + $0x50] sm:$0xff]  }
   0x2   :  { %v783_v1 = vld [vmem:[%s1040_s1] sm:$0xff]   ;;  %690 = vmatprep.subr.bf16.mxu0 %v782_v0  ;;  %v787_v5 = vld [vmem:[%s1040_s1 + $0x8] sm:$0xff]   ;;  %v791_v9 = vld [vmem:[%s1040_s1 + $0x10] sm:$0xff]  }
   0x3   :  { %v784_v2 = vld [vmem:[%s1040_s1 + $0xc0] sm:$0xff]   ;;  %691 = vmatpush3.bf16.msra.mxu0 %v783_v1  ;;  %v788_v6 = vld [vmem:[%s1040_s1 + $0xc8] sm:$0xff]   ;;  %v792_v10 = vld [vmem:[%s1040_s1 + $0xd0] sm:$0xff]  }
   0x4   :  { %v785_v3 = vld [vmem:[%s1040_s1 + $0x80] sm:$0xff]   ;;  %712 = vmatprep.subr.bf16.mxu1 %v784_v2  ;;  %692 = vmatprep.subr.bf16.mxu0 %v786_v4  ;;  %v789_v7 = vld [vmem:[%s1040_s1 + $0x88] sm:$0xff]   ;;  %v793_v11 = vld [vmem:[%s1040_s1 + $0x90] sm:$0xff]  }
   0x5   :  { %713 = vmatpush3.bf16.msra.mxu1 %v785_v3  ;;  %v794_v12 = vld [vmem:[%s1040_s1 + $0x58] sm:$0xff]   ;;  %v798_v16 = vld [vmem:[%s1040_s1 + $0x60] sm:$0xff]   ;;  %v802_v20 = vld [vmem:[%s1040_s1 + $0x68] sm:$0xff]  }
   0x6   :  { %714 = vmatprep.subr.bf16.mxu1 %v788_v6  ;;  %v795_v13 = vld [vmem:[%s1040_s1 + $0x18] sm:$0xff]   ;;  %v799_v17 = vld [vmem:[%s1040_s1 + $0x20] sm:$0xff]   ;;  %v803_v21 = vld [vmem:[%s1040_s1 + $0x28] sm:$0xff]  }
   0x7   :  { %693 = vmatpush3.bf16.msra.mxu0 %v787_v5  ;;  %v796_v14 = vld [vmem:[%s1040_s1 + $0xd8] sm:$0xff]   ;;  %v800_v18 = vld [vmem:[%s1040_s1 + $0xe0] sm:$0xff]   ;;  %v804_v22 = vld [vmem:[%s1040_s1 + $0xe8] sm:$0xff]  }
   0x8   :  { %694 = vmatprep.subr.bf16.mxu0 %v790_v8  ;;  %v797_v15 = vld [vmem:[%s1040_s1 + $0x98] sm:$0xff]   ;;  %v801_v19 = vld [vmem:[%s1040_s1 + $0xa0] sm:$0xff]   ;;  %v805_v23 = vld [vmem:[%s1040_s1 + $0xa8] sm:$0xff]  }
   0x9   :  { %715 = vmatpush3.bf16.msra.mxu1 %v789_v7  ;;  %v806_v24 = vld [vmem:[%s1040_s1 + $0x70] sm:$0xff]   ;;  %v810_v28 = vld [vmem:[%s1040_s1 + $0x78] sm:$0xff]   ;;  %v819_v36 = vld [vmem:[%s1041_s0 + $0xc] ss:$20 sps:$4 sm:$0xff]  }
   0xa   :  { %716 = vmatprep.subr.bf16.mxu1 %v792_v10  ;;  %v807_v25 = vld [vmem:[%s1040_s1 + $0x30] sm:$0xff]   ;;  %v811_v29 = vld [vmem:[%s1040_s1 + $0x38] sm:$0xff]   ;;  %v820_v37 = vld [vmem:[%s1040_s1 + $0x100] sm:$0xff]   ;;  %424 = vmatprep.mubr.bf16.mxu1 %v819_v36 }
   0xb   :  { %695 = vmatpush3.bf16.msra.mxu0 %v791_v9  ;;  %v808_v26 = vld [vmem:[%s1040_s1 + $0xf0] sm:$0xff]   ;;  %v812_v30 = vld [vmem:[%s1040_s1 + $0xf8] sm:$0xff]   ;;  %v821_v38 = vld [vmem:[%s1040_s1 + $0x108] sm:$0xff]  }
   0xc   :  { %696 = vmatprep.subr.bf16.mxu0 %v794_v12  ;;  %v809_v27 = vld [vmem:[%s1040_s1 + $0xb0] sm:$0xff]   ;;  %v815_v32 = vld [vmem:[%s1041_s0 + $0x4] ss:$20 sps:$4 sm:$0xff]   ;;  %v817_v35 = vld [vmem:[%s1041_s0 + $0x8] ss:$20 sps:$4 sm:$0xff]  }
   0xd   :  { %717 = vmatpush3.bf16.msra.mxu1 %v793_v11  ;;  %v813_v31 = vld [vmem:[%s1041_s0] ss:$20 sps:$4 sm:$0xff]   ;;  %v816_v34 = vld [vmem:[%s1040_s1 + $0xb8] sm:$0xff]   ;;  %383 = vmatprep.mubr.bf16.mxu0 %v815_v32  ;;  %v824_v41 = vld [vmem:[%s1041_s0 + $0x10] ss:$20 sps:$4 sm:$0xff]  }
   0xe   :  { %718 = vmatprep.subr.bf16.mxu1 %v796_v14  ;;  %v822_v39 = vld [vmem:[%s1040_s1 + $0x110] sm:$0xff]   ;;  %v823_v40 = vld [vmem:[%s1040_s1 + $0x118] sm:$0xff]   ;;  %v825_v42 = vld [vmem:[%s1042_s3] sm:$0xff]  }
   0xf   :  { %697 = vmatpush3.bf16.msra.mxu0 %v795_v13  ;;  %v826_v43 = vld [vmem:[%s1042_s3 + $0x8] sm:$0xff]   ;;  %v827_v44 = vld [vmem:[%s1042_s3 + $0x10] sm:$0xff]   ;;  %v828_v45 = vld [vmem:[%s1042_s3 + $0x18] sm:$0xff]  }
  0x10   :  { %698 = vmatprep.subr.bf16.mxu0 %v798_v16  ;;  %v829_v46 = vld [vmem:[%s1042_s3 + $0x20] sm:$0xff]   ;;  %v830_v47 = vld [vmem:[%s1042_s3 + $0x28] sm:$0xff]   ;;  %v831_v48 = vld [vmem:[%s1042_s3 + $0x30] sm:$0xff]  }
  0x11   :  { %719 = vmatpush3.bf16.msra.mxu1 %v797_v15  ;;  %v832_v49 = vld [vmem:[%s1042_s3 + $0x38] sm:$0xff]   ;;  %v630_v51 = vld [vmem:[%s1043_s2] ss:$0 sm:$0xff] }
  0x12   :  { %720 = vmatprep.subr.bf16.mxu1 %v800_v18 }
  0x13   :  { %699 = vmatpush3.bf16.msra.mxu0 %v799_v17 }
  0x14   :  { %700 = vmatprep.subr.bf16.mxu0 %v802_v20  ;;  %v675_v20 = vld [vmem:[%s1044_s4] ss:$0 sm:$0xff] }
  0x15   :  { %721 = vmatpush3.bf16.msra.mxu1 %v801_v19 }
  0x16   :  { %722 = vmatprep.subr.bf16.mxu1 %v804_v22 }
  0x17   :  { %701 = vmatpush3.bf16.msra.mxu0 %v803_v21 }
  0x18   :  { %702 = vmatprep.subr.bf16.mxu0 %v806_v24 }
  0x19   :  { %723 = vmatpush3.bf16.msra.mxu1 %v805_v23 }
  0x1a   :  { %724 = vmatprep.subr.bf16.mxu1 %v808_v26 }
  0x1b   :  { %703 = vmatpush3.bf16.msra.mxu0 %v807_v25 }
  0x1c   :  { %704 = vmatprep.subr.bf16.mxu0 %v810_v28 }
  0x1d   :  { %725 = vmatpush3.bf16.msra.mxu1 %v809_v27 }
  0x1e   :  { %726 = vmatprep.subr.bf16.mxu1 %v812_v30 }
  0x1f   :  { %705 = vmatpush3.bf16.msra.mxu0 %v811_v29 }
  0x20   :  { %748 = vmatprep.subr.bf16.mxu0 %v849_v33 }
  0x21   :  { %727 = vmatpush3.bf16.msra.mxu1 %v816_v34 }
  0x22   :  { %384 = vmatmul.mubr.bf16.vlgmr.msra.gmra.mrb[0].mxu0 %v813_v31  ;;  %760 = vmatprep.subr.bf16.mxu1 %v849_v33 }
  0x23   :  { %756 = vmatprep.mubr.msk.bf16.mxu0 %vm850_vm0, %v849_v33  ;;  %749 = vmatpush3.bf16.msra.mxu0 %v820_v37 }
  0x24   :  { %425 = vmatmul.mubr.bf16.vlgmr.msra.gmra.mrb[0].mxu1 %v817_v35  ;;  %750 = vmatprep.subr.bf16.mxu0 %v849_v33 }
  0x25   :  { %776 = vmatprep.mubr.msk.bf16.mxu1 %vm850_vm0, %v849_v33  ;;  %761 = vmatpush3.bf16.msra.mxu1 %v825_v42 }
  0x26   :  { %762 = vmatprep.subr.bf16.mxu1 %v849_v33 }
  0x27   :  { %751 = vmatpush3.bf16.msra.mxu0 %v821_v38 }
  0x28   :  { %752 = vmatprep.subr.bf16.mxu0 %v849_v33 }
  0x29   :  { %763 = vmatpush3.bf16.msra.mxu1 %v826_v43 }
  0x2a   :  { %764 = vmatprep.subr.bf16.mxu1 %v849_v33 }
  0x2b   :  { %753 = vmatpush3.bf16.msra.mxu0 %v822_v39 }
  0x2c   :  { %754 = vmatprep.subr.bf16.mxu0 %v849_v33 }
  0x2d   :  { %765 = vmatpush3.bf16.msra.mxu1 %v827_v44 }
  0x2e   :  { %766 = vmatprep.subr.bf16.mxu1 %v849_v33 }
  0x2f   :  { %755 = vmatpush3.bf16.msra.mxu0 %v823_v40 }
  0x31   :  { %767 = vmatpush3.bf16.msra.mxu1 %v828_v45 }
  0x32   :  { %757 = vmatmul.mubr.msk.bf16.vlgmr.msra.gmra.mrb[4].mxu0 %vm347_vm1, %v824_v41  ;;  %768 = vmatprep.subr.bf16.mxu1 %v849_v33 }
  0x35   :  { %769 = vmatpush3.bf16.msra.mxu1 %v829_v46 }
  0x36   :  { %770 = vmatprep.subr.bf16.mxu1 %v849_v33 }
  0x39   :  { %771 = vmatpush3.bf16.msra.mxu1 %v830_v47 }
  0x3a   :  { %772 = vmatprep.subr.bf16.mxu1 %v849_v33 }
  0x3d   :  { %773 = vmatpush3.bf16.msra.mxu1 %v831_v48 }
  0x3e   :  { %774 = vmatprep.subr.bf16.mxu1 %v849_v33 }
  0x41   :  { %775 = vmatpush3.bf16.msra.mxu1 %v832_v49 }
  0xf5   :  { %v706_v50 = vpop.f32.mrb[0].mxu0 }
  0xf6   :  { %v707_v52 = vpop.f32.mrb[1].mxu0 }
  0xf7   :  { %v708_v53 = vadd.f32 %v707_v52, %v706_v50  ;;  %v709_v54 = vpop.f32.mrb[2].mxu0  ;;  %v728_v55 = vpop.f32.mrb[0].mxu1 }
  0xf8   :  { %v710_v56 = vpop.f32.mrb[3].mxu0  ;;  %v729_v59 = vpop.f32.mrb[1].mxu1 }
  0xf9   :  { %v386_v57 = vadd.f32 %v708_v53, %v630_v51  ;;  %v711_v58 = vadd.f32 %v710_v56, %v709_v54  ;;  %v730_v60 = vadd.f32 %v729_v59, %v728_v55  ;;  %v731_v61 = vpop.f32.mrb[2].mxu1 }
  0xfa   :  { %v732_v63 = vpop.f32.mrb[3].mxu1 }
  0xfb   :  { %v389_v62 = vadd.f32 %v711_v58, %v630_v51  ;;  %v733_v0 = vadd.f32 %v732_v63, %v731_v61  ;;  %v427_v1 = vadd.f32 %v730_v60, %v386_v57 }
  0xfd   :  { %v430_v2 = vadd.f32 %v733_v0, %v389_v62 }
 0x105   :  { %v467_v3 = vpop.f32.mrb[4].mxu0 }
 0x106   :  { %v468_v4 = vadd.f32 %v467_v3, %v427_v1  ;;  %v758_v5 = vpop.f32.mrb[5].mxu0 }
 0x107   :  { %v470_v6 = vpop.f32.mrb[6].mxu0 }
 0x108   :  { %v673_v7 = vmul.f32 -1.442695, %v468_v4  ;;  %v471_v8 = vadd.f32 %v470_v6, %v430_v2  ;;  %v759_v9 = vpop.f32.mrb[7].mxu0 }
 0x10a   :  { %833 = vpow2.f32 %v673_v7  ;;  %v674_v10 = vmul.f32 -1.442695, %v471_v8 }
 0x10c   :  { %835 = vpow2.f32 %v674_v10 }
 0x114   :  { %v834_v11 = vpop.eup %833 }
 0x115   :  { %v480_v12 = vadd.f32 1.0, %v834_v11 }
 0x116   :  { %v836_v13 = vpop.eup %835 }
 0x117   :  { %837 = vrcp.f32 %v480_v12  ;;  %v481_v14 = vadd.f32 1.0, %v836_v13 }
 0x119   :  { %839 = vrcp.f32 %v481_v14 }
 0x121   :  { %v838_v15 = vpop.eup %837 }
 0x122   :  { %v486_v17 = vmul.f32 %v838_v15, %v468_v4 }
 0x123   :  { %v840_v16 = vpop.eup %839 }
 0x124   :  { %v487_v18 = vmul.f32 %v840_v16, %v471_v8 }
 0x126   :  { %v488_v19 = vpack.c.bf16 %v487_v18, %v486_v17 }
 0x128   :  { %777 = vmatmul.mubr.bf16.vlgmr.msra.gmra.mrb[4].mxu1 %v488_v19 }
 0x1fb   :  { %v594_v21 = vpop.f32.mrb[4].mxu1 }
 0x1fc   :  { %v595_v22 = vadd.f32 %v675_v20, %v594_v21  ;;  %v778_v23 = vpop.f32.mrb[5].mxu1 }
 0x1fd   :  { %v597_v24 = vpop.f32.mrb[6].mxu1 }
 0x1fe   :  { %v684_v25 = vmul.f32 -1.442695, %v595_v22  ;;  %v598_v26 = vadd.f32 %v675_v20, %v597_v24  ;;  %v779_v27 = vpop.f32.mrb[7].mxu1 }
 0x200   :  { %841 = vpow2.f32 %v684_v25  ;;  %v685_v28 = vmul.f32 -1.442695, %v598_v26 }
 0x202   :  { %843 = vpow2.f32 %v685_v28 }
 0x20a   :  { %v842_v29 = vpop.eup %841 }
 0x20b   :  { %v607_v30 = vadd.f32 1.0, %v842_v29 }
 0x20c   :  { %v844_v31 = vpop.eup %843 }
 0x20d   :  { %845 = vrcp.f32 %v607_v30  ;;  %v608_v32 = vadd.f32 1.0, %v844_v31 }
 0x20f   :  { %847 = vrcp.f32 %v608_v32 }
 0x217   :  { %v846_v33 = vpop.eup %845 }
 0x218   :  { %v613_v34 = vmul.f32 %v846_v33, %v595_v22 }
 0x219   :  { %v848_v35 = vpop.eup %847 }
 0x21a   :  { %v688_v36 = vpack.c.bf16 %v613_v34, %v613_v34  ;;  %v614_v37 = vmul.f32 %v848_v35, %v598_v26 }
 0x21c   :  { %624 = vst.msk [vmem:[%s1045_s5] sm:$0xf] %vm623_vm2, %v688_v36  ;;  %v689_v38 = vpack.c.bf16 %v614_v37, %v614_v37 }
 0x21e   :  { %625 = vst.msk [vmem:[%s1045_s5 + $0x4] sm:$0xf] %vm623_vm2, %v689_v38 }

</bundles_post_ra>
